<compile_context>
chip_gen: v7x
topology: tpu7x:2x2x1
jax: 0.10.0
libtpu: 0.0.40
codegen_flags: <defaults>
</compile_context>

<pallas_src>
import functools

import numpy as np

import jax
import jax.numpy as jnp
from jax.experimental import pallas as pl
from jax.experimental.pallas import tpu as pltpu


def _round_up(x, m):
    return (x + m - 1) // m * m


# ----------------------------------------------------------------------------
# pltpu.roll sign-convention probe (fails loudly if neither convention matches).
# True  <=>  pltpu.roll(x, 1, axis) == jnp.roll(x, 1, axis).
# ----------------------------------------------------------------------------
def _roll_is_jnp_like() -> bool:
    def k(x_ref, o_ref):
        o_ref[...] = pltpu.roll(x_ref[...], 1, axis=1)

    x = jnp.arange(8 * 128, dtype=jnp.float32).reshape(8, 128)
    y = pl.pallas_call(k, out_shape=jax.ShapeDtypeStruct((8, 128), jnp.float32))(x)
    if bool(y[0, 0] == x[0, 127]):
        return True
    if bool(y[0, 0] == x[0, 1]):
        return False
    raise RuntimeError("pltpu.roll convention probe is inconclusive")


def _auto_images_per_step(n_batch: int) -> int:
    # v7x has 2 TensorCores per chip: keep a >=2-way 'parallel' grid there.
    # Single-TC chips (v5e/v6e): fuse the whole batch into one grid step so the
    # lane width nb*HW amortises the ~0.35us per-grid-step overhead.
    kind = ""
    try:
        kind = jax.devices()[0].device_kind.lower()
    except Exception:
        pass
    if "v7" in kind and n_batch >= 2:
        return n_batch // 2 if n_batch % 2 == 0 else 1
    return max(n_batch, 1)


# ----------------------------------------------------------------------------
# Fused kernel: upsample(x1) -> conv_shift(concat)+BN+ReLU -> RK4 ODE
# ----------------------------------------------------------------------------
def _up_fused_kernel(x1_ref, x2_ref, u_ref, ccs_ref, code_ref, wcs_ref, wode_ref,
                     out_ref, *, W, nb, HW, c1, cin_cs, cin_cs_pad, cpad,
                     n_steps, dt, roll_like_jnp):
    f32 = jnp.float32
    L = nb * HW            # lane extent: nb images, each HW contiguous lanes

    # ---- loop invariants hoisted once ---------------------------------------
    U = u_ref[...]                                     # (Hs*Ws, HW) upsample matrix
    w_cs = wcs_ref[...]                                # (cpad, 9*cin_cs_pad + 8)
    w_ode = wode_ref[...]                              # (cpad, 9*cpad + 8)
    ccs = ccs_ref[...]                                 # conv_shift masks + bias rows
    code = code_ref[...]                               # ODE conv masks + bias rows
    mask_cs, bias_cs = ccs[:9 * cin_cs_pad], ccs[9 * cin_cs_pad:]     # aligned views
    mask_ode, bias_ode = code[:9 * cpad], code[9 * cpad:]

    def conv3x3(xp, w2, tap_mask, bias_rows):
        # shift-then-mix 3x3 conv (pad=1): stack the 9 lane-rolled copies of the
        # (cin_pad, L) input (tile-aligned 8-row blocks), zero edge/image wrap-around
        # with ONE fused mask multiply, append the bias ones-row block, ONE matmul.
        blocks = []
        for t in range(9):
            dy, dx = divmod(t, 3)
            s = (dy - 1) * W + (dx - 1)                # flat-spatial tap offset
            if s == 0:
                blocks.append(xp)
            else:
                shift = (-s) % L if roll_like_jnp else s % L
                blocks.append(pltpu.roll(xp, shift, 1))       # XLU lane rotation
        taps = jnp.concatenate(blocks, axis=0) * tap_mask      # (9*cin_pad, L)
        stacked = jnp.concatenate([taps, bias_rows], axis=0)   # (9*cin_pad + 8, L)
        return jnp.dot(w2, stacked, preferred_element_type=f32)  # (cpad, L)

    # ---- bilinear x2 upsample (align_corners) + zero pad, per image ----------
    x1_all = x1_ref[...]                                        # (nb*c1, Hs*Ws)
    ups = [jnp.dot(x1_all[j * c1:(j + 1) * c1, :], U, preferred_element_type=f32)
           for j in range(nb)]                                  # each (c1, HW)
    x1_up = ups[0] if nb == 1 else jnp.concatenate(ups, axis=-1)  # (c1, L)

    # ---- conv_shift(cat[x2, up(x1)]) + folded BN + ReLU ----------------------
    parts = [x2_ref[...], x1_up]
    if cin_cs < cin_cs_pad:
        parts.append(jnp.zeros((cin_cs_pad - cin_cs, L), f32))
    x_in = jnp.concatenate(parts, axis=0)                       # (cin_cs_pad, L)
    y0 = jnp.maximum(conv3x3(x_in, w_cs, mask_cs, bias_cs), 0.0)  # (cpad, L)

    # ---- odeint(ODE_Conv, y0, [0, 0.05], method='rk4', step_size=0.01) -------
    def f(y):  # ODE_Conv.forward(t, y): conv3x3 + folded BN + Softplus (t unused)
        z = conv3x3(y, w_ode, mask_ode, bias_ode)
        # stable softplus == torch Softplus(beta=1, threshold=20) to f32 precision
        return jnp.maximum(z, 0.0) + jnp.log1p(jnp.exp(-jnp.abs(z)))

    third = 1.0 / 3.0

    def rk_step(_, y):
        # torchdiffeq fixed-grid 'rk4' = rk4_alt_step_func (3/8 rule)
        k1 = f(y)
        k2 = f(y + dt * third * k1)
        k3 = f(y + dt * (k2 - third * k1))
        k4 = f(y + dt * (k1 - k2 + k3))
        return y + dt * 0.125 * (k1 + 3.0 * (k2 + k3) + k4)

    y = jax.lax.fori_loop(0, n_steps, rk_step, y0, unroll=True)
    out_ref[...] = y.astype(out_ref.dtype)


# ----------------------------------------------------------------------------
# Host-side (numpy) constants: upsample matrix, tap masks + bias rows
# ----------------------------------------------------------------------------
def _axis_interp_np(n_in, n_up, n_out, pad):
    # 1-D align_corners x2 upsample followed by zero-pad, as an (n_out, n_in) matrix.
    o = np.arange(n_out)
    u = o - pad
    valid = (u >= 0) & (u < n_up)
    scale = (n_in - 1) / (n_up - 1) if n_up > 1 else 0.0
    s = np.clip(u, 0, n_up - 1).astype(np.float64) * scale
    i0 = np.clip(np.floor(s).astype(np.int64), 0, n_in - 1)
    i1 = np.minimum(i0 + 1, n_in - 1)
    f = s - i0
    w = np.zeros((n_out, n_in), np.float64)
    w[np.arange(n_out), i0] += 1.0 - f
    w[np.arange(n_out), i1] += f
    return (w * valid[:, None]).astype(np.float32)


def _upsample_matrix_np(Hs, Ws, H, W):
    # U[(y*Ws + x), (h*W + w)] so that  x1_flat @ U == pad(bilinear_up2(x1)) flat.
    Ho, Wo = 2 * Hs, 2 * Ws
    pad_t, pad_l = (H - Ho) // 2, (W - Wo) // 2
    Uy = _axis_interp_np(Hs, Ho, H, pad_t)   # (H, Hs)
    Ux = _axis_interp_np(Ws, Wo, W, pad_l)   # (W, Ws)
    return np.einsum('hy,wx->yxhw', Uy, Ux).reshape(Hs * Ws, H * W).astype(np.float32)


def _conv_consts_np(H, W, nb, cin_pad):
    # (9*cin_pad + 8, nb*HW): per-tap validity masks broadcast over each cin_pad
    # block, tiled across the nb lane-fused images, followed by the bias rows
    # block ([1, 0, ..., 0]) that feeds the folded-BN bias column of the weights.
    HW = H * W
    p = np.arange(HW)
    h, w = p // W, p % W
    rows = []
    for dy in range(3):
        for dx in range(3):
            ok = ((h + dy - 1 >= 0) & (h + dy - 1 < H) &
                  (w + dx - 1 >= 0) & (w + dx - 1 < W))
            rows.append(ok.astype(np.float32))
    mask9 = np.tile(np.stack(rows), (1, nb))               # (9, nb*HW)
    mask = np.repeat(mask9, cin_pad, axis=0)               # (9*cin_pad, nb*HW)
    bias_rows = np.zeros((8, nb * HW), np.float32)
    bias_rows[0, :] = 1.0
    return np.concatenate([mask, bias_rows], axis=0).astype(np.float32)


# ----------------------------------------------------------------------------
# Parameter preparation (eval-mode BN folded into stacked-tap conv weights)
# ----------------------------------------------------------------------------
def _fold_bn(conv_bias, gamma, beta, mean, var, eps=1e-5):
    scale = gamma / jnp.sqrt(var + eps)
    shift = beta + (conv_bias - mean) * scale
    return scale, shift


def _pack_conv(w_oihw, scale, shift, cin_pad, cout_pad):
    # -> (cout_pad, 9*cin_pad + 8); column t*cin_pad+i of row o holds
    #    scale[o]*w[o,i,dy,dx] with t = dy*3+dx; the first column of the trailing
    #    8-wide block holds the folded-BN bias (paired with the ones bias row).
    Cout, Cin = w_oihw.shape[:2]
    w = (w_oihw * scale[:, None, None, None]).astype(jnp.float32)
    w_t = jnp.transpose(w, (2, 3, 1, 0)).reshape(9, Cin, Cout)            # (tap, i, o)
    w_t = jnp.pad(w_t, ((0, 0), (0, cin_pad - Cin), (0, cout_pad - Cout)))
    w_t = w_t.reshape(9 * cin_pad, cout_pad)
    bias_blk = jnp.zeros((8, cout_pad), jnp.float32).at[0, :Cout].set(shift)
    return jnp.concatenate([w_t, bias_blk], axis=0).T                     # (cout_pad, K)


# ----------------------------------------------------------------------------
# Wrapper: PyTorch-style NCHW in / NCHW out, single fused pallas_call.
# ----------------------------------------------------------------------------
def up_forward(x1_nchw, x2_nchw, params, *, images_per_step=None,
               roll_like_jnp=True, t0=0.0, t1=0.05, step_size=0.01):
    f32 = jnp.float32
    N, C1, Hs, Ws = x1_nchw.shape
    N2, C2, H, W = x2_nchw.shape
    assert N == N2
    Cout, Cin_cs = params["cs_w"].shape[:2]
    assert Cin_cs == C1 + C2
    HW = H * W
    n_steps = int(round((t1 - t0) / step_size))

    cpad = _round_up(Cout, 8)
    cin_cs_pad = _round_up(Cin_cs, 8)

    nb = images_per_step if images_per_step is not None else _auto_images_per_step(N)
    assert N % nb == 0, (N, nb)
    G = N // nb
    L = nb * HW

    # Lane-fused batch layout: per grid step the activations are (C, nb*HW), with
    # image j occupying lanes [j*HW, (j+1)*HW).  x1 keeps per-image rows for the
    # small upsample matmuls.
    x1g = x1_nchw.astype(f32).reshape(G, nb * C1, Hs * Ws)
    x2g = (x2_nchw.astype(f32).reshape(G, nb, C2, HW)
           .transpose(0, 2, 1, 3).reshape(G, C2, L))

    U = jnp.asarray(_upsample_matrix_np(Hs, Ws, H, W))              # (Hs*Ws, HW)
    const_cs = jnp.asarray(_conv_consts_np(H, W, nb, cin_cs_pad))   # masks + bias rows
    const_ode = jnp.asarray(_conv_consts_np(H, W, nb, cpad))

    # TODO(synk): train-mode BatchNorm batch statistics are not reproduced.
    s_cs, b_cs = _fold_bn(params["cs_b"], params["cs_gamma"], params["cs_beta"],
                          params["cs_mean"], params["cs_var"])
    w_cs = _pack_conv(params["cs_w"], s_cs, b_cs, cin_cs_pad, cpad)
    s_od, b_od = _fold_bn(params["ode_b"], params["ode_gamma"], params["ode_beta"],
                          params["ode_mean"], params["ode_var"])
    w_ode = _pack_conv(params["ode_w"], s_od, b_od, cpad, cpad)

    kernel = functools.partial(
        _up_fused_kernel, W=W, nb=nb, HW=HW, c1=C1, cin_cs=Cin_cs,
        cin_cs_pad=cin_cs_pad, cpad=cpad, n_steps=n_steps, dt=step_size,
        roll_like_jnp=roll_like_jnp)

    out = pl.pallas_call(
        kernel,
        out_shape=jax.ShapeDtypeStruct((G, cpad, L), jnp.float32),
        grid=(G,),
        in_specs=[
            pl.BlockSpec((None, nb * C1, Hs * Ws), lambda g: (g, 0, 0)),   # x1 (per-image rows)
            pl.BlockSpec((None, C2, L), lambda g: (g, 0, 0)),              # x2 (lane-fused batch)
            pl.BlockSpec((Hs * Ws, HW), lambda g: (0, 0)),                 # upsample matrix
            pl.BlockSpec((9 * cin_cs_pad + 8, L), lambda g: (0, 0)),       # conv_shift masks+bias rows
            pl.BlockSpec((9 * cpad + 8, L), lambda g: (0, 0)),             # ODE conv masks+bias rows
            pl.BlockSpec((cpad, 9 * cin_cs_pad + 8), lambda g: (0, 0)),    # conv_shift weights
            pl.BlockSpec((cpad, 9 * cpad + 8), lambda g: (0, 0)),          # ODE conv weights
        ],
        out_specs=pl.BlockSpec((None, cpad, L), lambda g: (g, 0, 0)),
        compiler_params=pltpu.CompilerParams(
            dimension_semantics=("parallel",),
            vmem_limit_bytes=32 * 1024 * 1024),
    )(x1g, x2g, U, const_cs, const_ode, w_cs, w_ode)

    out = (out.reshape(G, cpad, nb, HW).transpose(0, 2, 1, 3)
              .reshape(N, cpad, H, W)[:, :Cout])
    return out


# ----------------------------------------------------------------------------
# Pure-JAX reference (independent conv / bilinear paths) for validation.
# ----------------------------------------------------------------------------
def _reference_forward(x1, x2, params, *, t0=0.0, t1=0.05, step_size=0.01, eps=1e-5):
    f32 = jnp.float32
    x1 = x1.astype(f32)
    x2 = x2.astype(f32)
    _, _, Hs, Ws = x1.shape
    H, W = x2.shape[2], x2.shape[3]
    Ho, Wo = 2 * Hs, 2 * Ws

    def coords(n_in, n_out):
        s = (jnp.arange(n_out, dtype=f32) * ((n_in - 1) / (n_out - 1))
             if n_out > 1 else jnp.zeros((n_out,), f32))
        i0 = jnp.clip(jnp.floor(s), 0, n_in - 1).astype(jnp.int32)
        i1 = jnp.minimum(i0 + 1, n_in - 1)
        return s - i0.astype(f32), i0, i1

    fy, y0i, y1i = coords(Hs, Ho)
    fx, x0i, x1i = coords(Ws, Wo)

    def interp_w(img):
        return img[..., x0i] * (1.0 - fx) + img[..., x1i] * fx

    up = (interp_w(x1[:, :, y0i, :]) * (1.0 - fy)[:, None]
          + interp_w(x1[:, :, y1i, :]) * fy[:, None])
    dY, dX = H - Ho, W - Wo
    up = jnp.pad(up, ((0, 0), (0, 0), (dY // 2, dY - dY // 2),
                      (dX // 2, dX - dX // 2)))
    x = jnp.concatenate([x2, up], axis=1)

    def conv_bn(v, w, b, gamma, beta, mean, var):
        y = jax.lax.conv_general_dilated(v, w.astype(f32), (1, 1), 'SAME',
                                         dimension_numbers=('NCHW', 'OIHW', 'NCHW'),
                                         precision=jax.lax.Precision.HIGHEST)
        y = y + b[None, :, None, None]
        inv = gamma / jnp.sqrt(var + eps)
        return (inv[None, :, None, None] * (y - mean[None, :, None, None])
                + beta[None, :, None, None])

    y = jax.nn.relu(conv_bn(x, params["cs_w"], params["cs_b"], params["cs_gamma"],
                            params["cs_beta"], params["cs_mean"], params["cs_var"]))

    def f(v):
        z = conv_bn(v, params["ode_w"], params["ode_b"], params["ode_gamma"],
                    params["ode_beta"], params["ode_mean"], params["ode_var"])
        return jnp.where(z > 20.0, z, jnp.log1p(jnp.exp(jnp.minimum(z, 20.0))))

    dt = step_size
    for _ in range(int(round((t1 - t0) / step_size))):
        k1 = f(y)
        k2 = f(y + dt / 3.0 * k1)
        k3 = f(y + dt * (k2 - k1 / 3.0))
        k4 = f(y + dt * (k1 - k2 + k3))
        y = y + dt * 0.125 * (k1 + 3.0 * (k2 + k3) + k4)
    return y


if __name__ == "__main__":
    key = jax.random.PRNGKey(0)
    ks = jax.random.split(key, 10)

    # Up(in_channels=8, out_channels=4, bilinear=True)
    N, c_half, Hs, Ws = 2, 4, 8, 8            # x1: half channels, half spatial size
    in_ch, out_ch = 2 * c_half, 4
    H, W = 2 * Hs, 2 * Ws                     # 16 x 16

    x1 = jax.random.normal(ks[0], (N, c_half, Hs, Ws), jnp.float32)    # NCHW
    x2 = jax.random.normal(ks[1], (N, c_half, H, W), jnp.float32)      # NCHW

    params = dict(
        # conv_shift: Conv2d(in_ch, out_ch, 3, pad=1) + BatchNorm2d(out_ch)
        cs_w=0.1 * jax.random.normal(ks[2], (out_ch, in_ch, 3, 3), jnp.float32),
        cs_b=0.1 * jax.random.normal(ks[3], (out_ch,), jnp.float32),
        cs_gamma=1.0 + 0.1 * jax.random.normal(ks[4], (out_ch,), jnp.float32),
        cs_beta=0.1 * jax.random.normal(ks[5], (out_ch,), jnp.float32),
        cs_mean=jnp.zeros((out_ch,), jnp.float32),
        cs_var=jnp.ones((out_ch,), jnp.float32),
        # ODE_Conv: Conv2d(out_ch, out_ch, 3, pad=1) + BatchNorm2d(out_ch) + Softplus
        ode_w=0.1 * jax.random.normal(ks[6], (out_ch, out_ch, 3, 3), jnp.float32),
        ode_b=0.1 * jax.random.normal(ks[7], (out_ch,), jnp.float32),
        ode_gamma=1.0 + 0.1 * jax.random.normal(ks[8], (out_ch,), jnp.float32),
        ode_beta=0.1 * jax.random.normal(ks[9], (out_ch,), jnp.float32),
        ode_mean=jnp.zeros((out_ch,), jnp.float32),
        ode_var=jnp.ones((out_ch,), jnp.float32),
    )

    roll_like_jnp = _roll_is_jnp_like()        # resolved once, outside jit (static)
    nb = _auto_images_per_step(N)              # batch fusion (1 TC) vs 2-way grid (v7x)
    fwd = jax.jit(functools.partial(up_forward, images_per_step=nb,
                                    roll_like_jnp=roll_like_jnp))
    out = jax.block_until_ready(fwd(x1, x2, params))
    assert out.shape == (N, out_ch, H, W), out.shape
    assert bool(jnp.all(jnp.isfinite(out)))

    # End-to-end validation against an independent pure-JAX reference (catches
    # roll-direction / mask / weight-packing regressions loudly).
    ref = jax.block_until_ready(jax.jit(_reference_forward)(x1, x2, params))
    err = float(jnp.max(jnp.abs(out - ref)))
    assert err < 1e-2, f"kernel vs reference mismatch: max abs err = {err}"

    print("KERNEL_OK")
</pallas_src>

<mosaic_0001>
module attributes {stable_mosaic.version = 11 : i64} {
  func.func @k(%arg0: memref<8x128xf32, #tpu.memory_space<vmem>>, %arg1: memref<8x128xf32, #tpu.memory_space<vmem>>) attributes {dimension_semantics = [], scalar_prefetch = 0 : i64, scratch_operands = 0 : i64, tpu.core_type = #tpu.core_type<tc>} {
    %c0 = arith.constant 0 : index
    %c0_0 = arith.constant 0 : index
    %0 = vector.load %arg0[%c0, %c0_0] : memref<8x128xf32, #tpu.memory_space<vmem>>, vector<8x128xf32>
    %c1_i32 = arith.constant 1 : i32
    %1 = tpu.dynamic_rotate %0 by %c1_i32 dim 1 : vector<8x128xf32>, i32 -> vector<8x128xf32>
    %c0_1 = arith.constant 0 : index
    %c0_2 = arith.constant 0 : index
    %2 = vector.load %arg1[%c0_1, %c0_2] : memref<8x128xf32, #tpu.memory_space<vmem>>, vector<8x128xf32>
    tpu.vector_store %arg1[%c0_1, %c0_2], %1 {strides = array<i32>} : memref<8x128xf32, #tpu.memory_space<vmem>>, vector<8x128xf32>,
    return
  }
}

</mosaic_0001>

<bundles_post_ra>
// kernel: tpu_custom_call.1
= control target key start
LH: loop header
LB: loop body
LE: loop exit
PB: predicated region body
PF: predicated region fallthrough
CT: control target
= control target key end

     0   :  { %6 = vsyncpa [#allocation3], 0  ;;  %s128_s0 = inlined_call_operand.hbm [shape: f32[8,128], index: 0, kind: input, shape index: {}]   ;;  %s129_s1 = inlined_call_operand.hbm [shape: f32[8,128], index: 1, kind: output, shape index: {}]  }
   0x1   :  { %7 = vsyncpa [#allocation4], 0  ;;  %s91_s6 = smov [#allocation2]   ;;  %s43_s10 = scalar_lea.hbm %s128_s0, 128 }
   0x2   :  { %s14_s7 = sshll.u32 %s91_s6, 4  ;;  %p44_p0 = scmp.ne.s32.totalorder %s128_s0, %s43_s10  ;;  %s15_s7 = int_to_ptr.vmem [resolvable:$true] %s14_s7 }
   0x3   :  { %p47_p1 = scmp.lt.u32.totalorder %s43_s10, %s128_s0 }
   0x5   :  { %p49_p2 = pnand %p47_p1, %p44_p0 }
   0x7   :  { %52 = shalt.err (!%p49_p2)
}
   0x8   :  { %s53_s15 = scalar_lea.vmem %s15_s7, 128  ;;  %p58_p4 = scmp.lt.s32.totalorder %s15_s7, %s15_s7 }
   0x9   :  { %p54_p3 = scmp.ne.s32.totalorder %s15_s7, %s53_s15  ;;  %p59_p5 = scmp.lt.s32.totalorder %s53_s15, %s53_s15 }
   0xb   :  { %p60_p6 = por %p59_p5, %p58_p4 }
   0xd   :  { %p61_p7 = pnand %p60_p6, %p54_p3 }
   0xf   :  { %64 = shalt.err (!%p61_p7)
}
  0x10   :  { %17 = dma.hbm_to_vmem [thread:$0]  %s128_s0, 128, %s15_s7, [#allocation3]  }
  0x11   :  { %87 = dma.done.wait [#allocation3], 128  }
  0x12   :  { %88 = vsyncadd [#allocation3], 4294967168  ;;  %v21_v0 = vld [vmem:[#allocation2] sm:$0xff]  ;;  %s92_s18 = smov 1   ;;  %s93_s19 = smov [#allocation5]  }
  0x13   :  { %22 = vrot.lane.b32.xlu0 %v21_v0, %s92_s18  ;;  %s31_s20 = sshll.u32 %s93_s19, 4  ;;  %s32_s20 = int_to_ptr.vmem [resolvable:$true] %s31_s20 }
  0x14   :  { %s65_s21 = scalar_lea.vmem %s32_s20, 128  ;;  %p70_p9 = scmp.lt.s32.totalorder %s32_s20, %s32_s20 }
  0x15   :  { %p66_p8 = scmp.ne.s32.totalorder %s32_s20, %s65_s21  ;;  %p71_p10 = scmp.lt.s32.totalorder %s65_s21, %s65_s21 }
  0x17   :  { %p72_p11 = por %p71_p10, %p70_p9 }
  0x19   :  { %p73_p12 = pnand %p72_p11, %p66_p8 }
  0x85   :  { %v23_v1 = vpop.permute.xlu0 %22 }
  0x86   :  { %24 = vst [vmem:[#allocation5] sm:$0xff] %v23_v1 }
  0x87   :  { %76 = shalt.err (!%p73_p12)
}
  0x88   :  { %s77_s0 = scalar_lea.hbm %s129_s1, 128 }
  0x89   :  { %p78_p13 = scmp.ne.s32.totalorder %s129_s1, %s77_s0  ;;  %p81_p0 = scmp.lt.u32.totalorder %s77_s0, %s129_s1 }
  0x8b   :  { %p83_p1 = pnand %p81_p0, %p78_p13 }
  0x8d   :  { %86 = shalt.err (!%p83_p1)
}
  0x8e   :  { %34 = dma.vmem_to_hbm [thread:$0]  %s32_s20, 128, %s129_s1, [#allocation4]  }
  0x8f   :  { %89 = dma.done.wait [#allocation4], 128  }
  0x90   :  { %90 = vsyncadd [#allocation4], 4294967168 }
  0x91   :  { %38 = vsyncpa [#allocation3], 1 }
  0x92   :  { %39 = vsyncpa [#allocation4], 1 }

</bundles_post_ra>
